<compile_context>
chip_gen: v5e
topology: v5e:2x2
jax: 0.10.0
libtpu: 0.0.40
codegen_flags: <defaults>
</compile_context>

<pallas_src>
import jax
import jax.numpy as jnp
from jax.experimental import pallas as pl
from jax.experimental.pallas import tpu as pltpu


def _cdiv(a, b):
    return (a + b - 1) // b


def _round_up(a, b):
    return _cdiv(a, b) * b


def _mish_kernel(x_ref, o_ref):
    x = x_ref[...].astype(jnp.float32)
    # t in (0, 1]; never overflows.
    t = jnp.exp(-jnp.abs(x))
    u = (1.0 + t) * (1.0 + t)
    w = jnp.where(x >= 0.0, t * t, 1.0)
    num = u - w
    den = u + w                       # den in (1, 5] -> safe for reciprocal
    r = pl.reciprocal(den, approx=True)
    r = r * (2.0 - den * r)           # one Newton step -> ~f32-exact 1/den
    o_ref[...] = (x * num * r).astype(o_ref.dtype)


_LANE_CANDIDATES = (1024, 512, 256, 128)
_TARGET_BLOCK_BYTES = 4 * 1024 * 1024     # ~4 MiB streaming tiles


def mish(x):
    """Elementwise Mish. Any shape; preserves shape & dtype."""
    orig_shape = x.shape
    dtype = x.dtype
    n = x.size
    if n == 0:
        return x
    itemsize = jnp.dtype(dtype).itemsize

    # Lane width: largest multiple-of-128 divisor of n -> zero-copy wrapper.
    W = None
    for cand in _LANE_CANDIDATES:
        if n % cand == 0:
            W = cand
            break
    padded = W is None
    if padded:
        W = 128
    n_pad = _round_up(n, W)
    rows = n_pad // W

    # Row tile: ~4 MiB per block, multiple of 32 (bf16/int8 packed sublanes),
    # capped so mid-size inputs still give >= 2-4 grid steps (v7x megacore).
    tr_target = max(32, (_TARGET_BLOCK_BYTES // (itemsize * W)) // 32 * 32)
    if rows <= 32:
        tr = rows                      # block == full array dim -> legal
    else:
        tr = min(tr_target, rows)
        quarter = max(32, _round_up(_cdiv(rows, 4), 32))
        tr = max(32, (min(tr, quarter) // 32) * 32)
    grid = (_cdiv(rows, tr),)          # ragged last block is masked by Pallas

    flat = x.reshape(-1)
    if padded:
        # Rare path (n % 128 != 0). mish(0) == 0, so zero padding is inert;
        # allow_input_fusion lets XLA fuse this pad into the kernel input.
        flat = jnp.pad(flat, (0, n_pad - n))
    slab = flat.reshape(rows, W)

    cost = pl.CostEstimate(
        flops=14 * n_pad,              # ~14 VALU ops per element
        transcendentals=2 * n_pad,     # exp + reciprocal
        bytes_accessed=2 * n_pad * itemsize,
    )
    compiler_params = pltpu.CompilerParams(
        dimension_semantics=("parallel",),
        vmem_limit_bytes=32 * 1024 * 1024,
        allow_input_fusion=[True] if padded else None,
    )

    out = pl.pallas_call(
        _mish_kernel,
        out_shape=jax.ShapeDtypeStruct((rows, W), dtype),
        grid_spec=pltpu.PrefetchScalarGridSpec(
            num_scalar_prefetch=0,
            grid=grid,
            in_specs=[pl.BlockSpec((tr, W), lambda i: (i, 0))],
            out_specs=pl.BlockSpec((tr, W), lambda i: (i, 0)),
        ),
        compiler_params=compiler_params,
        cost_estimate=cost,
    )(slab)

    if padded:
        return out.reshape(-1)[:n].reshape(orig_shape)
    return out.reshape(orig_shape)


def _mish_ref(x):
    xf = x.astype(jnp.float32)
    sp = jnp.maximum(xf, 0.0) + jnp.log1p(jnp.exp(-jnp.abs(xf)))
    return (xf * jnp.tanh(sp)).astype(x.dtype)


if __name__ == "__main__":
    key = jax.random.PRNGKey(0)
    # NCHW activation, consistent with the module's usage.
    x = jax.random.normal(key, (2, 4, 16, 16), dtype=jnp.float32)
    y = jax.block_until_ready(mish(x))
    assert y.shape == x.shape and y.dtype == x.dtype
    assert jnp.allclose(y, _mish_ref(x), atol=2e-5, rtol=2e-5)

    # Ragged-last-row-block path (rows not a multiple of the row tile, no pad).
    x2 = 3.0 * jax.random.normal(jax.random.PRNGKey(1), (2, 3, 37, 64),
                                 dtype=jnp.float32)
    y2 = jax.block_until_ready(mish(x2))
    assert jnp.allclose(y2, _mish_ref(x2), atol=2e-5, rtol=2e-5)

    # Padded path (size not a multiple of 128) -> exercises allow_input_fusion.
    x3 = 3.0 * jax.random.normal(jax.random.PRNGKey(2), (3, 5, 7),
                                 dtype=jnp.float32)
    y3 = jax.block_until_ready(mish(x3))
    assert jnp.allclose(y3, _mish_ref(x3), atol=2e-5, rtol=2e-5)

    print("KERNEL_OK")
</pallas_src>

<mosaic_0001>
module attributes {stable_mosaic.version = 11 : i64} {
  func.func @_mish_kernel(%arg0: i32, %arg1: memref<2x1024xf32, #tpu.memory_space<vmem>>, %arg2: memref<2x1024xf32, #tpu.memory_space<vmem>>) attributes {dimension_semantics = [#tpu.dimension_semantics<parallel>], iteration_bounds = array<i64: 1>, scalar_prefetch = 0 : i64, scratch_operands = 0 : i64, tpu.core_type = #tpu.core_type<tc>, window_params = [{transform_indices = @transform_0, window_bounds = array<i64: 2, 1024>}, {transform_indices = @transform_1, window_bounds = array<i64: 2, 1024>}]} {
    %c0 = arith.constant 0 : index
    %c0_0 = arith.constant 0 : index
    %0 = vector.load %arg1[%c0, %c0_0] : memref<2x1024xf32, #tpu.memory_space<vmem>>, vector<2x1024xf32>
    %1 = math.absf %0 : vector<2x1024xf32>
    %cst = arith.constant 0.000000e+00 : f32
    %2 = vector.broadcast %cst : f32 to vector<2x1024xf32>
    %3 = arith.subf %2, %1 : vector<2x1024xf32>
    %4 = math.exp %3 : vector<2x1024xf32>
    %cst_1 = arith.constant 1.000000e+00 : f32
    %5 = vector.broadcast %cst_1 : f32 to vector<2x1024xf32>
    %6 = arith.addf %5, %4 : vector<2x1024xf32>
    %cst_2 = arith.constant 1.000000e+00 : f32
    %7 = vector.broadcast %cst_2 : f32 to vector<2x1024xf32>
    %8 = arith.addf %7, %4 : vector<2x1024xf32>
    %9 = arith.mulf %6, %8 : vector<2x1024xf32>
    %cst_3 = arith.constant 0.000000e+00 : f32
    %10 = vector.broadcast %cst_3 : f32 to vector<2x1024xf32>
    %11 = arith.cmpf oge, %0, %10 : vector<2x1024xf32>
    %12 = arith.mulf %4, %4 : vector<2x1024xf32>
    %cst_4 = arith.constant 1.000000e+00 : f32
    %13 = vector.broadcast %cst_4 : f32 to vector<2x1024xf32>
    %14 = arith.select %11, %12, %13 : vector<2x1024xi1>, vector<2x1024xf32>
    %15 = arith.subf %9, %14 : vector<2x1024xf32>
    %16 = arith.addf %9, %14 : vector<2x1024xf32>
    %17 = tpu.reciprocal %16 {approx = true} : vector<2x1024xf32> -> vector<2x1024xf32>
    %18 = arith.mulf %16, %17 : vector<2x1024xf32>
    %cst_5 = arith.constant 2.000000e+00 : f32
    %19 = vector.broadcast %cst_5 : f32 to vector<2x1024xf32>
    %20 = arith.subf %19, %18 : vector<2x1024xf32>
    %21 = arith.mulf %17, %20 : vector<2x1024xf32>
    %22 = arith.mulf %0, %15 : vector<2x1024xf32>
    %23 = arith.mulf %22, %21 : vector<2x1024xf32>
    %c0_6 = arith.constant 0 : index
    %c0_7 = arith.constant 0 : index
    %24 = vector.load %arg2[%c0_6, %c0_7] : memref<2x1024xf32, #tpu.memory_space<vmem>>, vector<2x1024xf32>
    tpu.vector_store %arg2[%c0_6, %c0_7], %23 {strides = array<i32>} : memref<2x1024xf32, #tpu.memory_space<vmem>>, vector<2x1024xf32>,
    return
  }
  func.func @transform_0(%arg0: i32) -> (i32, i32) {
    %c0_i32 = arith.constant 0 : i32
    %c0_i32_0 = arith.constant 0 : i32
    return %arg0, %c0_i32 : i32, i32
  }
  func.func @transform_1(%arg0: i32) -> (i32, i32) {
    %c0_i32 = arith.constant 0 : i32
    %c0_i32_0 = arith.constant 0 : i32
    return %arg0, %c0_i32 : i32, i32
  }
}

</mosaic_0001>

<bundles_post_ra>
// kernel: tpu_custom_call.1
= control target key start
LH: loop header
LB: loop body
LE: loop exit
PB: predicated region body
PF: predicated region fallthrough
CT: control target
= control target key end

     0   :  { %6 = vsyncpa [#allocation3], 0  ;;  %s158_s0 = inlined_call_operand.hbm [shape: f32[2,1024], index: 0, kind: input, shape index: {}]   ;;  %s159_s1 = inlined_call_operand.hbm [shape: f32[2,1024], index: 1, kind: output, shape index: {}]  }
   0x1   :  { %7 = vsyncpa [#allocation4], 0  ;;  %s13_s8 = sshll.u32 %s158_s0, 4  ;;  %s140_s9 = smov [#allocation2]   ;;  %s14_s8 = int_to_ptr.hbm [resolvable:$true] %s13_s8 }
   0x2   :  { %s15_s10 = sshll.u32 %s140_s9, 4  ;;  %s16_s10 = int_to_ptr.vmem [resolvable:$true] %s15_s10 }
   0x3   :  { %18 = dma.hbm_to_vmem [thread:$0]  %s14_s8, 256, %s16_s10, [#allocation3]  }
   0x4   :  { %136 = dma.done.wait [#allocation3], 256  }
   0x5   :  { %137 = vsyncadd [#allocation3], 4294967040  ;;  %v23_v0 = vld [vmem:[#allocation2] sm:$0xff]  ;;  %v24_v1 = vld [vmem:[#allocation2 + $0x8] sm:$0xff]  ;;  %s141_s0 = smov [#allocation5]   ;;  %s68_s14 = sshll.u32 %s159_s1, 4  ;;  %s69_s14 = int_to_ptr.hbm [resolvable:$true] %s68_s14 }
   0x6   :  { %v25_v2 = vand.u32 2147483647, %v23_v0  ;;  %v26_v3 = vand.u32 2147483647, %v24_v1  ;;  %vm37_vm0 = vcmp.ge.f32.partialorder %v23_v0, 0.0  ;;  %vm38_vm1 = vcmp.ge.f32.partialorder %v24_v1, 0.0 }
   0x7   :  { %s66_s11 = sshll.u32 %s141_s0, 4  ;;  %s67_s11 = int_to_ptr.vmem [resolvable:$true] %s66_s11 }
   0x8   :  { %v27_v4 = vsub.f32 0.0, %v25_v2  ;;  %v28_v5 = vsub.f32 0.0, %v26_v3 }
   0xa   :  { %v29_v6 = vmul.f32 1.442695, %v27_v4  ;;  %v31_v7 = vmul.f32 1.442695, %v28_v5 }
   0xc   :  { %80 = vpow2.f32 %v29_v6 }
   0xd   :  { %82 = vpow2.f32 %v31_v7 }
  0x12   :  { %v81_v8 = vpop.eup %80 }
  0x13   :  { %v83_v9 = vpop.eup %82  ;;  %v33_v10 = vadd.f32 1.0, %v81_v8  ;;  %v39_v11 = vmul.f32 %v81_v8, %v81_v8 }
  0x14   :  { %v34_v12 = vadd.f32 1.0, %v83_v9  ;;  %v40_v13 = vmul.f32 %v83_v9, %v83_v9 }
  0x15   :  { %v35_v14 = vmul.f32 %v33_v10, %v33_v10  ;;  %v41_v15 = vsel %vm37_vm0, %v39_v11, 1.0 }
  0x16   :  { %v36_v16 = vmul.f32 %v34_v12, %v34_v12  ;;  %v42_v17 = vsel %vm38_vm1, %v40_v13, 1.0 }
  0x17   :  { %v45_v18 = vadd.f32 %v41_v15, %v35_v14  ;;  %v43_v20 = vsub.f32 %v35_v14, %v41_v15 }
  0x18   :  { %v46_v19 = vadd.f32 %v42_v17, %v36_v16  ;;  %v44_v22 = vsub.f32 %v36_v16, %v42_v17 }
  0x19   :  { %84 = vrcp.f32 %v45_v18  ;;  %v55_v27 = vmul.f32 %v43_v20, %v23_v0 }
  0x1a   :  { %86 = vrcp.f32 %v46_v19  ;;  %v56_v29 = vmul.f32 %v44_v22, %v24_v1 }
  0x1f   :  { %v85_v21 = vpop.eup %84 }
  0x20   :  { %v87_v23 = vpop.eup %86  ;;  %v49_v24 = vmul.f32 %v85_v21, %v45_v18 }
  0x21   :  { %v50_v25 = vmul.f32 %v87_v23, %v46_v19 }
  0x22   :  { %v51_v26 = vsub.f32 2.0, %v49_v24 }
  0x23   :  { %v52_v28 = vsub.f32 2.0, %v50_v25 }
  0x24   :  { %v53_v30 = vmul.f32 %v85_v21, %v51_v26 }
  0x25   :  { %v54_v31 = vmul.f32 %v87_v23, %v52_v28 }
  0x26   :  { %v57_v32 = vmul.f32 %v55_v27, %v53_v30 }
  0x27   :  { %v58_v33 = vmul.f32 %v56_v29, %v54_v31 }
  0x28   :  { %59 = vst [vmem:[#allocation5] sm:$0xff] %v57_v32 }
  0x29   :  { %60 = vst [vmem:[#allocation5 + $0x8] sm:$0xff] %v58_v33 }
  0x2a   :  { %71 = dma.vmem_to_hbm [thread:$0]  %s67_s11, 256, %s69_s14, [#allocation4]  }
  0x2b   :  { %138 = dma.done.wait [#allocation4], 256  }
  0x2c   :  { %139 = vsyncadd [#allocation4], 4294967040 }
  0x2d   :  { %76 = vsyncpa [#allocation3], 1 }
  0x2e   :  { %77 = vsyncpa [#allocation4], 1 }

</bundles_post_ra>
